<compile_context>
chip_gen: v6e
topology: v6e:2x2x1
jax: 0.10.0
libtpu: 0.0.40
codegen_flags: <defaults>
</compile_context>

<pallas_src>
import jax
import jax.numpy as jnp
from jax.experimental import pallas as pl
from jax.experimental.pallas import tpu as pltpu


def _round_up(x, m):
    return ((x + m - 1) // m) * m


def _conv_chain_kernel(x1_ref, x2_ref, x3_ref, x4_ref, x5_ref, w_ref, b_ref, o_ref):
    # x*_ref: (Cin, T)   channels in sublanes, pixels in lanes
    # w_ref:  (Cout, Cin), b_ref: (Cout, 1), o_ref: (Cout, T)
    cout, cin = w_ref.shape
    T = o_ref.shape[-1]

    w = w_ref[...]
    # Hoist loop-invariant broadcasts (JAX does not CSE broadcast_in_dim):
    # one lane-broadcast per weight column and one for the bias, reused by
    # all five convolutions.
    wb = [jnp.broadcast_to(w[:, c:c + 1], (cout, T)) for c in range(cin)]
    bb = jnp.broadcast_to(b_ref[...], (cout, T))

    def conv(x_ref):
        xk = x_ref[...]                              # (Cin, T)
        acc = bb + wb[0] * xk[0:1, :]                # (Cout, T) VPU FMAs
        for c in range(1, cin):
            acc = acc + wb[c] * xk[c:c + 1, :]
        return acc

    a1 = conv(x1_ref)
    a2 = conv(x2_ref)
    a3 = conv(x3_ref)
    a4 = conv(x4_ref)
    a5 = conv(x5_ref)

    a6 = a1 * a2 * a3 * a4 * a5        # uses original a2
    a7 = a2 * a1                       # torch: a2.mul_(a1) -> a2 mutated; a7 aliases it
    a8 = a6 * a7
    a9 = a1 * a7 * a3 * a4 * a5        # uses mutated a2 (== a7)

    # Exact divide: preserves x/0 -> +/-Inf and x/Inf -> 0 semantics and is
    # free under the memory bound.
    o_ref[...] = a8 / a9


def model_forward(x1, x2, x3, x4, x5, weight, bias, *, max_tile=2048):
    """x*: (N, Cin, H, W) float32, weight: (Cout, Cin, 1, 1), bias: (Cout,)."""
    N, Cin, H, W = x1.shape
    Cout = weight.shape[0]
    Hp, Wp = H + 2, W + 2              # kernel=1, stride=1, padding=1 -> H+2, W+2
    HWp = Hp * Wp

    def prep(x):
        # Only the semantically required spatial zero-pad; the flattening
        # reshape is contiguous and free.  NCHW already gives channels in
        # sublanes / pixels in lanes -> no transposes anywhere.
        xp = jnp.pad(x.astype(jnp.float32), ((0, 0), (0, 0), (1, 1), (1, 1)))
        return xp.reshape(N, Cin, HWp)

    xs = [prep(x) for x in (x1, x2, x3, x4, x5)]

    w = weight.reshape(Cout, Cin).astype(jnp.float32)    # (Cout, Cin)
    b = bias.reshape(Cout, 1).astype(jnp.float32)        # (Cout, 1)

    # Lane tile: multiple of 128, as large as ~max_tile, but keep >=4 grid
    # steps where possible so v7x's two TensorCores both get work.
    tile = min(_round_up(HWp, 128), _round_up(max_tile, 128))
    while tile > 128 and N * pl.cdiv(HWp, tile) < 4:
        tile -= 128

    grid = (N, pl.cdiv(HWp, tile))

    x_spec = pl.BlockSpec((None, Cin, tile), lambda n, i: (n, 0, i))

    out = pl.pallas_call(
        _conv_chain_kernel,
        out_shape=jax.ShapeDtypeStruct((N, Cout, HWp), jnp.float32),
        grid_spec=pltpu.PrefetchScalarGridSpec(
            num_scalar_prefetch=0,
            grid=grid,
            in_specs=[x_spec, x_spec, x_spec, x_spec, x_spec,
                      pl.BlockSpec((Cout, Cin), lambda n, i: (0, 0)),
                      pl.BlockSpec((Cout, 1), lambda n, i: (0, 0))],
            out_specs=pl.BlockSpec((None, Cout, tile), lambda n, i: (n, 0, i)),
        ),
        compiler_params=pltpu.CompilerParams(
            dimension_semantics=("parallel", "parallel")),
    )(*xs, w, b)

    # (N, Cout, HWp) -> NCHW, no transpose required.
    return out.reshape(N, Cout, Hp, Wp)


def _reference(x1, x2, x3, x4, x5, weight, bias):
    """Pure-JAX reference reproducing the PyTorch semantics (incl. in-place mul_),
    with the same per-channel accumulation order as the kernel."""
    Cout, Cin = weight.shape[0], weight.shape[1]
    w = weight.reshape(Cout, Cin)

    def conv(x):
        xp = jnp.pad(x, ((0, 0), (0, 0), (1, 1), (1, 1)))           # (N,Cin,Hp,Wp)
        acc = bias[None, :, None, None] + w[None, :, 0, None, None] * xp[:, None, 0]
        for c in range(1, Cin):
            acc = acc + w[None, :, c, None, None] * xp[:, None, c]
        return acc                                                   # (N,Cout,Hp,Wp)

    a1, a2, a3, a4, a5 = conv(x1), conv(x2), conv(x3), conv(x4), conv(x5)
    a6 = a1 * a2 * a3 * a4 * a5
    a7 = a2 * a1
    a8 = a6 * a7
    a9 = a1 * a7 * a3 * a4 * a5
    return a8 / a9


if __name__ == "__main__":
    key = jax.random.PRNGKey(0)
    k1, k2, k3, k4, k5, kw, kb = jax.random.split(key, 7)

    N, Cin, H, W = 2, 3, 16, 16
    Cout = 8

    x1 = jax.random.normal(k1, (N, Cin, H, W), dtype=jnp.float32)
    x2 = jax.random.normal(k2, (N, Cin, H, W), dtype=jnp.float32)
    x3 = jax.random.normal(k3, (N, Cin, H, W), dtype=jnp.float32)
    x4 = jax.random.normal(k4, (N, Cin, H, W), dtype=jnp.float32)
    x5 = jax.random.normal(k5, (N, Cin, H, W), dtype=jnp.float32)

    # Deterministic parameter init (Conv2d(3, 8, 1) -> weight (8,3,1,1), bias (8,))
    fan_in = Cin * 1 * 1
    bound = 1.0 / (fan_in ** 0.5)
    weight = jax.random.uniform(kw, (Cout, Cin, 1, 1), jnp.float32, -bound, bound)
    bias = jax.random.uniform(kb, (Cout,), jnp.float32, -bound, bound)

    out = model_forward(x1, x2, x3, x4, x5, weight, bias)
    out = jax.block_until_ready(out)

    ref = _reference(x1, x2, x3, x4, x5, weight, bias)
    assert out.shape == (N, Cout, H + 2, W + 2), out.shape
    assert jnp.allclose(out, ref, rtol=1e-5, atol=1e-5), "mismatch vs reference"

    print("KERNEL_OK")
</pallas_src>

<mosaic_0001>
module attributes {stable_mosaic.version = 11 : i64} {
  func.func @_conv_chain_kernel(%arg0: i32, %arg1: i32, %arg2: memref<1x3x256xf32, #tpu.memory_space<vmem>>, %arg3: memref<1x3x256xf32, #tpu.memory_space<vmem>>, %arg4: memref<1x3x256xf32, #tpu.memory_space<vmem>>, %arg5: memref<1x3x256xf32, #tpu.memory_space<vmem>>, %arg6: memref<1x3x256xf32, #tpu.memory_space<vmem>>, %arg7: memref<8x3xf32, #tpu.memory_space<vmem>>, %arg8: memref<8x1xf32, #tpu.memory_space<vmem>>, %arg9: memref<1x8x256xf32, #tpu.memory_space<vmem>>) attributes {dimension_semantics = [#tpu.dimension_semantics<parallel>, #tpu.dimension_semantics<parallel>], iteration_bounds = array<i64: 2, 2>, scalar_prefetch = 0 : i64, scratch_operands = 0 : i64, tpu.core_type = #tpu.core_type<tc>, window_params = [{transform_indices = @transform_0, window_bounds = array<i64: 1, 3, 256>}, {transform_indices = @transform_1, window_bounds = array<i64: 1, 3, 256>}, {transform_indices = @transform_2, window_bounds = array<i64: 1, 3, 256>}, {transform_indices = @transform_3, window_bounds = array<i64: 1, 3, 256>}, {transform_indices = @transform_4, window_bounds = array<i64: 1, 3, 256>}, {pipeline_mode = #tpu.pipeline_mode<synchronous>, transform_indices = @transform_5, window_bounds = array<i64: 8, 3>}, {pipeline_mode = #tpu.pipeline_mode<synchronous>, transform_indices = @transform_6, window_bounds = array<i64: 8, 1>}, {transform_indices = @transform_7, window_bounds = array<i64: 1, 8, 256>}]} {
    %c0 = arith.constant 0 : index
    %c0_0 = arith.constant 0 : index
    %0 = vector.load %arg7[%c0, %c0_0] : memref<8x3xf32, #tpu.memory_space<vmem>>, vector<8x3xf32>
    %1 = vector.extract_strided_slice %0 {offsets = [0, 0], sizes = [8, 1], strides = [1, 1]} : vector<8x3xf32> to vector<8x1xf32>
    %2 = vector.shape_cast %1 : vector<8x1xf32> to vector<8x1xf32>
    %3 = vector.broadcast %2 : vector<8x1xf32> to vector<8x256xf32>
    %4 = vector.extract_strided_slice %0 {offsets = [0, 1], sizes = [8, 1], strides = [1, 1]} : vector<8x3xf32> to vector<8x1xf32>
    %5 = vector.shape_cast %4 : vector<8x1xf32> to vector<8x1xf32>
    %6 = vector.broadcast %5 : vector<8x1xf32> to vector<8x256xf32>
    %7 = vector.extract_strided_slice %0 {offsets = [0, 2], sizes = [8, 1], strides = [1, 1]} : vector<8x3xf32> to vector<8x1xf32>
    %8 = vector.shape_cast %7 : vector<8x1xf32> to vector<8x1xf32>
    %9 = vector.broadcast %8 : vector<8x1xf32> to vector<8x256xf32>
    %c0_1 = arith.constant 0 : index
    %c0_2 = arith.constant 0 : index
    %10 = vector.load %arg8[%c0_1, %c0_2] : memref<8x1xf32, #tpu.memory_space<vmem>>, vector<8x1xf32>
    %11 = vector.shape_cast %10 : vector<8x1xf32> to vector<8x1xf32>
    %12 = vector.broadcast %11 : vector<8x1xf32> to vector<8x256xf32>
    %c0_3 = arith.constant 0 : index
    %c0_4 = arith.constant 0 : index
    %c0_5 = arith.constant 0 : index
    %13 = vector.load %arg2[%c0_3, %c0_4, %c0_5] : memref<1x3x256xf32, #tpu.memory_space<vmem>>, vector<1x3x256xf32>
    %14 = vector.shape_cast %13 : vector<1x3x256xf32> to vector<3x256xf32>
    %15 = vector.extract_strided_slice %14 {offsets = [0, 0], sizes = [1, 256], strides = [1, 1]} : vector<3x256xf32> to vector<1x256xf32>
    %16 = vector.broadcast %15 : vector<1x256xf32> to vector<8x256xf32>
    %17 = arith.mulf %3, %16 : vector<8x256xf32>
    %18 = arith.addf %12, %17 : vector<8x256xf32>
    %19 = vector.extract_strided_slice %14 {offsets = [1, 0], sizes = [1, 256], strides = [1, 1]} : vector<3x256xf32> to vector<1x256xf32>
    %20 = vector.broadcast %19 : vector<1x256xf32> to vector<8x256xf32>
    %21 = arith.mulf %6, %20 : vector<8x256xf32>
    %22 = arith.addf %18, %21 : vector<8x256xf32>
    %23 = vector.extract_strided_slice %14 {offsets = [2, 0], sizes = [1, 256], strides = [1, 1]} : vector<3x256xf32> to vector<1x256xf32>
    %24 = vector.broadcast %23 : vector<1x256xf32> to vector<8x256xf32>
    %25 = arith.mulf %9, %24 : vector<8x256xf32>
    %26 = arith.addf %22, %25 : vector<8x256xf32>
    %c0_6 = arith.constant 0 : index
    %c0_7 = arith.constant 0 : index
    %c0_8 = arith.constant 0 : index
    %27 = vector.load %arg3[%c0_6, %c0_7, %c0_8] : memref<1x3x256xf32, #tpu.memory_space<vmem>>, vector<1x3x256xf32>
    %28 = vector.shape_cast %27 : vector<1x3x256xf32> to vector<3x256xf32>
    %29 = vector.extract_strided_slice %28 {offsets = [0, 0], sizes = [1, 256], strides = [1, 1]} : vector<3x256xf32> to vector<1x256xf32>
    %30 = vector.broadcast %29 : vector<1x256xf32> to vector<8x256xf32>
    %31 = arith.mulf %3, %30 : vector<8x256xf32>
    %32 = arith.addf %12, %31 : vector<8x256xf32>
    %33 = vector.extract_strided_slice %28 {offsets = [1, 0], sizes = [1, 256], strides = [1, 1]} : vector<3x256xf32> to vector<1x256xf32>
    %34 = vector.broadcast %33 : vector<1x256xf32> to vector<8x256xf32>
    %35 = arith.mulf %6, %34 : vector<8x256xf32>
    %36 = arith.addf %32, %35 : vector<8x256xf32>
    %37 = vector.extract_strided_slice %28 {offsets = [2, 0], sizes = [1, 256], strides = [1, 1]} : vector<3x256xf32> to vector<1x256xf32>
    %38 = vector.broadcast %37 : vector<1x256xf32> to vector<8x256xf32>
    %39 = arith.mulf %9, %38 : vector<8x256xf32>
    %40 = arith.addf %36, %39 : vector<8x256xf32>
    %c0_9 = arith.constant 0 : index
    %c0_10 = arith.constant 0 : index
    %c0_11 = arith.constant 0 : index
    %41 = vector.load %arg4[%c0_9, %c0_10, %c0_11] : memref<1x3x256xf32, #tpu.memory_space<vmem>>, vector<1x3x256xf32>
    %42 = vector.shape_cast %41 : vector<1x3x256xf32> to vector<3x256xf32>
    %43 = vector.extract_strided_slice %42 {offsets = [0, 0], sizes = [1, 256], strides = [1, 1]} : vector<3x256xf32> to vector<1x256xf32>
    %44 = vector.broadcast %43 : vector<1x256xf32> to vector<8x256xf32>
    %45 = arith.mulf %3, %44 : vector<8x256xf32>
    %46 = arith.addf %12, %45 : vector<8x256xf32>
    %47 = vector.extract_strided_slice %42 {offsets = [1, 0], sizes = [1, 256], strides = [1, 1]} : vector<3x256xf32> to vector<1x256xf32>
    %48 = vector.broadcast %47 : vector<1x256xf32> to vector<8x256xf32>
    %49 = arith.mulf %6, %48 : vector<8x256xf32>
    %50 = arith.addf %46, %49 : vector<8x256xf32>
    %51 = vector.extract_strided_slice %42 {offsets = [2, 0], sizes = [1, 256], strides = [1, 1]} : vector<3x256xf32> to vector<1x256xf32>
    %52 = vector.broadcast %51 : vector<1x256xf32> to vector<8x256xf32>
    %53 = arith.mulf %9, %52 : vector<8x256xf32>
    %54 = arith.addf %50, %53 : vector<8x256xf32>
    %c0_12 = arith.constant 0 : index
    %c0_13 = arith.constant 0 : index
    %c0_14 = arith.constant 0 : index
    %55 = vector.load %arg5[%c0_12, %c0_13, %c0_14] : memref<1x3x256xf32, #tpu.memory_space<vmem>>, vector<1x3x256xf32>
    %56 = vector.shape_cast %55 : vector<1x3x256xf32> to vector<3x256xf32>
    %57 = vector.extract_strided_slice %56 {offsets = [0, 0], sizes = [1, 256], strides = [1, 1]} : vector<3x256xf32> to vector<1x256xf32>
    %58 = vector.broadcast %57 : vector<1x256xf32> to vector<8x256xf32>
    %59 = arith.mulf %3, %58 : vector<8x256xf32>
    %60 = arith.addf %12, %59 : vector<8x256xf32>
    %61 = vector.extract_strided_slice %56 {offsets = [1, 0], sizes = [1, 256], strides = [1, 1]} : vector<3x256xf32> to vector<1x256xf32>
    %62 = vector.broadcast %61 : vector<1x256xf32> to vector<8x256xf32>
    %63 = arith.mulf %6, %62 : vector<8x256xf32>
    %64 = arith.addf %60, %63 : vector<8x256xf32>
    %65 = vector.extract_strided_slice %56 {offsets = [2, 0], sizes = [1, 256], strides = [1, 1]} : vector<3x256xf32> to vector<1x256xf32>
    %66 = vector.broadcast %65 : vector<1x256xf32> to vector<8x256xf32>
    %67 = arith.mulf %9, %66 : vector<8x256xf32>
    %68 = arith.addf %64, %67 : vector<8x256xf32>
    %c0_15 = arith.constant 0 : index
    %c0_16 = arith.constant 0 : index
    %c0_17 = arith.constant 0 : index
    %69 = vector.load %arg6[%c0_15, %c0_16, %c0_17] : memref<1x3x256xf32, #tpu.memory_space<vmem>>, vector<1x3x256xf32>
    %70 = vector.shape_cast %69 : vector<1x3x256xf32> to vector<3x256xf32>
    %71 = vector.extract_strided_slice %70 {offsets = [0, 0], sizes = [1, 256], strides = [1, 1]} : vector<3x256xf32> to vector<1x256xf32>
    %72 = vector.broadcast %71 : vector<1x256xf32> to vector<8x256xf32>
    %73 = arith.mulf %3, %72 : vector<8x256xf32>
    %74 = arith.addf %12, %73 : vector<8x256xf32>
    %75 = vector.extract_strided_slice %70 {offsets = [1, 0], sizes = [1, 256], strides = [1, 1]} : vector<3x256xf32> to vector<1x256xf32>
    %76 = vector.broadcast %75 : vector<1x256xf32> to vector<8x256xf32>
    %77 = arith.mulf %6, %76 : vector<8x256xf32>
    %78 = arith.addf %74, %77 : vector<8x256xf32>
    %79 = vector.extract_strided_slice %70 {offsets = [2, 0], sizes = [1, 256], strides = [1, 1]} : vector<3x256xf32> to vector<1x256xf32>
    %80 = vector.broadcast %79 : vector<1x256xf32> to vector<8x256xf32>
    %81 = arith.mulf %9, %80 : vector<8x256xf32>
    %82 = arith.addf %78, %81 : vector<8x256xf32>
    %83 = arith.mulf %26, %40 : vector<8x256xf32>
    %84 = arith.mulf %83, %54 : vector<8x256xf32>
    %85 = arith.mulf %84, %68 : vector<8x256xf32>
    %86 = arith.mulf %85, %82 : vector<8x256xf32>
    %87 = arith.mulf %40, %26 : vector<8x256xf32>
    %88 = arith.mulf %86, %87 : vector<8x256xf32>
    %89 = arith.mulf %26, %87 : vector<8x256xf32>
    %90 = arith.mulf %89, %54 : vector<8x256xf32>
    %91 = arith.mulf %90, %68 : vector<8x256xf32>
    %92 = arith.mulf %91, %82 : vector<8x256xf32>
    %93 = arith.divf %88, %92 : vector<8x256xf32>
    %c0_18 = arith.constant 0 : index
    %c0_19 = arith.constant 0 : index
    %c0_20 = arith.constant 0 : index
    %94 = vector.load %arg9[%c0_18, %c0_19, %c0_20] : memref<1x8x256xf32, #tpu.memory_space<vmem>>, vector<1x8x256xf32>
    %95 = vector.shape_cast %94 : vector<1x8x256xf32> to vector<8x256xf32>
    %96 = vector.shape_cast %93 : vector<8x256xf32> to vector<1x8x256xf32>
    tpu.vector_store %arg9[%c0_18, %c0_19, %c0_20], %96 {strides = array<i32>} : memref<1x8x256xf32, #tpu.memory_space<vmem>>, vector<1x8x256xf32>,
    return
  }
  func.func @transform_0(%arg0: i32, %arg1: i32) -> (i32, i32, i32) {
    %c0_i32 = arith.constant 0 : i32
    %c0_i32_0 = arith.constant 0 : i32
    return %arg0, %c0_i32, %arg1 : i32, i32, i32
  }
  func.func @transform_1(%arg0: i32, %arg1: i32) -> (i32, i32, i32) {
    %c0_i32 = arith.constant 0 : i32
    %c0_i32_0 = arith.constant 0 : i32
    return %arg0, %c0_i32, %arg1 : i32, i32, i32
  }
  func.func @transform_2(%arg0: i32, %arg1: i32) -> (i32, i32, i32) {
    %c0_i32 = arith.constant 0 : i32
    %c0_i32_0 = arith.constant 0 : i32
    return %arg0, %c0_i32, %arg1 : i32, i32, i32
  }
  func.func @transform_3(%arg0: i32, %arg1: i32) -> (i32, i32, i32) {
    %c0_i32 = arith.constant 0 : i32
    %c0_i32_0 = arith.constant 0 : i32
    return %arg0, %c0_i32, %arg1 : i32, i32, i32
  }
  func.func @transform_4(%arg0: i32, %arg1: i32) -> (i32, i32, i32) {
    %c0_i32 = arith.constant 0 : i32
    %c0_i32_0 = arith.constant 0 : i32
    return %arg0, %c0_i32, %arg1 : i32, i32, i32
  }
  func.func @transform_5(%arg0: i32, %arg1: i32) -> (i32, i32) {
    %c0_i32 = arith.constant 0 : i32
    %c0_i32_0 = arith.constant 0 : i32
    %c0_i32_1 = arith.constant 0 : i32
    return %c0_i32, %c0_i32_0 : i32, i32
  }
  func.func @transform_6(%arg0: i32, %arg1: i32) -> (i32, i32) {
    %c0_i32 = arith.constant 0 : i32
    %c0_i32_0 = arith.constant 0 : i32
    %c0_i32_1 = arith.constant 0 : i32
    return %c0_i32, %c0_i32_0 : i32, i32
  }
  func.func @transform_7(%arg0: i32, %arg1: i32) -> (i32, i32, i32) {
    %c0_i32 = arith.constant 0 : i32
    %c0_i32_0 = arith.constant 0 : i32
    return %arg0, %c0_i32, %arg1 : i32, i32, i32
  }
}

</mosaic_0001>

<bundles_post_ra>
// kernel: tpu_custom_call.1
= control target key start
LH: loop header
LB: loop body
LE: loop exit
PB: predicated region body
PF: predicated region fallthrough
CT: control target
= control target key end

     0   :  { %s1572_s0 = inlined_call_operand.vmem [shape: f32[2,3,324], index: 0, kind: input, shape index: {}]   ;;  %s1573_s1 = inlined_call_operand.vmem [shape: f32[2,3,324], index: 1, kind: input, shape index: {}]   ;;  %s1574_s2 = inlined_call_operand.vmem [shape: f32[2,3,324], index: 2, kind: input, shape index: {}]   ;;  %s1575_s3 = inlined_call_operand.vmem [shape: f32[2,3,324], index: 3, kind: input, shape index: {}]   ;;  %s1576_s4 = inlined_call_operand.vmem [shape: f32[2,3,324], index: 4, kind: input, shape index: {}]   ;;  %s1577_s5 = inlined_call_operand.vmem [shape: f32[8,3], index: 5, kind: input, shape index: {}]   ;;  %s1578_s6 = inlined_call_operand.vmem [shape: f32[8,1], index: 6, kind: input, shape index: {}]   ;;  %s1579_s7 = inlined_call_operand.hbm [shape: f32[2,8,324], index: 7, kind: output, shape index: {}]  }
   0x1   :  { %1583 = sst [smem:[#allocation8_spill]] %s1577_s5 }
   0x2   :  { %1584 = sst [smem:[#allocation9_spill]] %s1578_s6 }
   0x3   :  { %12 = vsyncpa [#allocation3], 0 }
   0x4   :  { %14 = vsyncpa [#allocation3 + $0x1], 0  ;;  %s1361_s24 = smov 0   ;;  %s1363_s25 = smov 0  }
   0x5   :  { %s1365_s26 = smov 0   ;;  %s1367_s27 = smov 0  }
   0x6   :  { %s1369_s28 = smov 0   ;;  %s1371_s29 = smov 0  }
   0x7   :  { %s1373_s30 = smov 0   ;;  %s1375_s8 = smov 0  }
   0x8 LB: > { %1585 = sst [smem:[#allocation5_spill]] %s1311_s30  ;;  %s1114_s9 = sadd.s32 4294967295, %s1315_s8   ;;  %s1315_s8 = sphi %s1375_s8, %s20_s8   ;;  %s1311_s30 = sphi %s1373_s30, %s1596_s30   ;;  %s1307_s29 = sphi %s1371_s29, %s1601_s29   ;;  %s1303_s28 = sphi %s1369_s28, %s1594_s28   ;;  %s1299_s27 = sphi %s1367_s27, %s1600_s27   ;;  %s1295_s26 = sphi %s1365_s26, %s1599_s26   ;;  %s1291_s25 = sphi %s1363_s25, %s1598_s25   ;;  %s1287_s24 = sphi %s1361_s24, %s1597_s24  }
   0x9   : > { %s1115_s10 = sadd.s32 4294967294, %s1315_s8   ;;  %s29_s11 = sadd.s32 1, %s1307_s29 }
   0xa   : > { %p30_p0 = scmp.ge.s32.totalorder %s29_s11, 2  ;;  %s32_s12 = sadd.s32 1, %s1311_s30 }
   0xb   : > { %p233_p1 = scmp.ne.s32.totalorder %s1295_s26, %s1291_s25  ;;  %p234_p2 = scmp.eq.s32.totalorder %s1114_s9, 3 }
   0xc   : > { %s1603_s11 = smov (%p30_p0, %s29_s11), 0  ;;  %s1605_s12 = smov (!%p30_p0, %s32_s12), %s1311_s30 }
   0xd   : > { %1586 = sst [smem:[#allocation6_spill]] %s1603_s11  ;;  %s219_s13 = ssub.s32 %s1307_s29, %s1603_s11 }
   0xe   : > { %p1412_p3 = por %p234_p2, %p233_p1  ;;  %p34_p4 = scmp.ge.s32.totalorder %s1605_s12, 2 }
   0xf   : > { %p239_p5 = scmp.ne.s32.totalorder %s1291_s25, %s1287_s24  ;;  %p240_p6 = scmp.eq.s32.totalorder %s1115_s10, 3 }
  0x10   : > { %p1118_p7 = scmp.ge.s32.totalorder %s1315_s8, 1  ;;  %s1607_s12 = smov (%p34_p4, %s1605_s12), 0 }
  0x11   : > { %1588 = sst [smem:[#allocation7_spill]] %s1607_s12  ;;  %p1421_p8 = por %p240_p6, %p239_p5 }
  0x12   : > { %p369_p9 = scmp.lt.s32.totalorder %s1315_s8, 5  ;;  %s218_s16 = ssub.s32 %s1311_s30, %s1607_s12 }
  0x13   : > { %s223_s17 = sadd.s32 1, %s1295_s26  ;;  %s220_s18 = sor.u32 %s219_s13, %s218_s16 }
  0x14   : > { %p370_p10 = pnand %p1118_p7, %p369_p9  ;;  %p221_p11 = scmp.eq.s32.totalorder %s220_s18, 0 }
  0x15   : > { %s1590_s5 = sld [smem:[#allocation8_spill]] (!%p370_p10)  ;;  %s1440_s10 = sshll.u32 (!%p370_p10), %s1299_s27, 1 }
  0x16   : > { %s1430_s19 = scalar_select %p221_p11, %s1295_s26, %s223_s17  }
  0x17   : > { %373 = sbr.rel (%p370_p10) target bundleno = 222 (0xde), region = 48  ;;  %s1591_s6 = sld [smem:[#allocation9_spill]] (!%p370_p10) }
  0x18   : > { %p466_p12 = scmp.lt.s32.totalorder (!%p370_p10), %s1303_s28, 1  ;;  %p468_p13 = scmp.lt.s32.totalorder (!%p370_p10), %s1440_s10, 2 }
  0x1c   : > { %v556_v0 = vld [vmem:[%s1590_s5] sm:$0xff]  ;;  %v1317_v2 = vmov 0   ;;  %v1318_v3 = vmov 1   ;;  %v1319_v4 = vmov 2   ;;  %s467_s13 = scalar_select %p466_p12, %s1303_s28, 1  ;;  %v578_v5 = vlaneseq }
  0x1d   : > { %v570_v1 = vld [vmem:[%s1591_s6] sm:$0xff]  ;;  %1214 = vset.pattern.permute.xlu0 %v1317_v2  ;;  %1216 = vset.pattern.permute.xlu1 %v1317_v2  ;;  %s469_s16 = scalar_select %p468_p13, %s1440_s10, 2 }
  0x1e   : > { %559 = vperm.xlu0 %1214, %v556_v0   ;;  %573 = vperm.xlu1 %1216, %v570_v1   ;;  %s1139_s17 = smul.u32 3, %s467_s13  ;;  %v579_v6 = vshrl.u32 %v578_v5, 7  ;;  %s1592_s5 = sand.u32 1, %s1291_s25  }
  0x1f   : > { %s1119_s6 = sshll.u32 %s1592_s5, 4  ;;  %s949_s9 = ssub.s32 (%p1412_p3), 3, %s1440_s10 }
  0x20   : > { %s471_s18 = sadd.s32 %s1139_s17, %s469_s16  ;;  %v580_v7 = vsub.s32 0, %v579_v6  ;;  %v584_v8 = vsub.s32 4, %v579_v6  ;;  %v602_v15 = vsub.s32 1, %v579_v6  ;;  %v606_v19 = vsub.s32 5, %v579_v6  ;;  %s460_s30 = scalar_lea.vmem [#allocation2], %s1119_s6 }
  0x21   : > { %s1121_s20 = sshll.u32 %s471_s18, 2  ;;  %v1471_v24 = vsub.s32 2, %v579_v6  ;;  %v1473_v25 = vsub.s32 6, %v579_v6  ;;  %p950_p0 = scmp.lt.s32.totalorder (%p1412_p3), %s949_s9, 2 }
  0x22   : > { %1215 = vset.pattern.permute.xlu0 %v1318_v3  ;;  %1217 = vset.pattern.permute.xlu1 %v1319_v4  ;;  %s473_s23 = scalar_lea.vmem %s1572_s0, %s1121_s20  ;;  %s491_s27 = scalar_lea.vmem %s1573_s1, %s1121_s20 }
  0x23   : > { %563 = vperm.xlu0 %1215, %v556_v0   ;;  %567 = vperm.xlu1 %1217, %v556_v0   ;;  %s509_s11 = scalar_lea.vmem %s1574_s2, %s1121_s20  ;;  %s527_s16 = scalar_lea.vmem %s1575_s3, %s1121_s20  ;;  %v576_v9 = vld [vmem:[%s473_s23] sm:$0x77] }
  0x24   : > { %s545_s21 = scalar_lea.vmem %s1576_s4, %s1121_s20  ;;  %v644_v10 = vld [vmem:[%s491_s27] sm:$0x77]  ;;  %v581_v13 = vrot.slane %v576_v9, %v580_v7  ;;  %v585_v14 = vrot.slane %v576_v9, %v584_v8  ;;  %v603_v32 = vrot.slane %v576_v9, %v602_v15  ;;  %v607_v33 = vrot.slane %v576_v9, %v606_v19 }
  0x25   : > { %v1461_v11 = vld [vmem:[%s509_s11] sm:$0x77]  ;;  %v649_v16 = vrot.slane %v644_v10, %v580_v7  ;;  %v653_v17 = vrot.slane %v644_v10, %v584_v8  ;;  %v671_v38 = vrot.slane %v644_v10, %v602_v15  ;;  %v675_v39 = vrot.slane %v644_v10, %v606_v19  ;;  %s1593_s11 = smov %s1592_s5 }
  0x26   : > { %v1463_v12 = vld [vmem:[%s527_s16] sm:$0x77]  ;;  %v717_v20 = vrot.slane %v1461_v11, %v580_v7  ;;  %v721_v21 = vrot.slane %v1461_v11, %v584_v8  ;;  %v591_v26 = vrot.slane %v581_v13, %v580_v7  ;;  %v595_v27 = vrot.slane %v585_v14, %v580_v7  ;;  %s1513_s12 = scalar_lea.sflag [#allocation3], %s1593_s11 }
  0x27   : > { %1218 = vset.pattern.permute.xlu0 %v1317_v2  ;;  %v1465_v18 = vld [vmem:[%s545_s21] sm:$0x77]  ;;  %v785_v22 = vrot.slane %v1463_v12, %v580_v7  ;;  %v789_v23 = vrot.slane %v1463_v12, %v584_v8  ;;  %v659_v30 = vrot.slane %v649_v16, %v580_v7  ;;  %v663_v31 = vrot.slane %v653_v17, %v580_v7 }
  0x28   : > { %v853_v28 = vrot.slane %v1465_v18, %v580_v7  ;;  %v857_v29 = vrot.slane %v1465_v18, %v584_v8  ;;  %v727_v34 = vrot.slane %v717_v20, %v580_v7  ;;  %v731_v35 = vrot.slane %v721_v21, %v580_v7 }
  0x29   : > { %v795_v36 = vrot.slane %v785_v22, %v580_v7  ;;  %v799_v37 = vrot.slane %v789_v23, %v580_v7  ;;  %v739_v40 = vrot.slane %v1461_v11, %v602_v15  ;;  %v743_v41 = vrot.slane %v1461_v11, %v606_v19 }
  0x2a   : > { %v863_v42 = vrot.slane %v853_v28, %v580_v7  ;;  %v867_v43 = vrot.slane %v857_v29, %v580_v7  ;;  %v807_v44 = vrot.slane %v1463_v12, %v602_v15  ;;  %v811_v45 = vrot.slane %v1463_v12, %v606_v19 }
  0x2b   : > { %v613_v46 = vrot.slane %v603_v32, %v602_v15  ;;  %v617_v47 = vrot.slane %v607_v33, %v602_v15  ;;  %v875_v48 = vrot.slane %v1465_v18, %v602_v15  ;;  %v879_v49 = vrot.slane %v1465_v18, %v606_v19 }
  0x2c   : > { %v625_v50 = vrot.slane %v576_v9, %v1471_v24  ;;  %v629_v51 = vrot.slane %v576_v9, %v1473_v25  ;;  %v693_v52 = vrot.slane %v644_v10, %v1471_v24  ;;  %v697_v53 = vrot.slane %v644_v10, %v1473_v25 }
  0x2d   : > { %v681_v54 = vrot.slane %v671_v38, %v602_v15  ;;  %v685_v55 = vrot.slane %v675_v39, %v602_v15  ;;  %v749_v56 = vrot.slane %v739_v40, %v602_v15  ;;  %v753_v57 = vrot.slane %v743_v41, %v602_v15 }
  0x2e   : > { %v817_v58 = vrot.slane %v807_v44, %v602_v15  ;;  %v821_v59 = vrot.slane %v811_v45, %v602_v15  ;;  %v761_v60 = vrot.slane %v1461_v11, %v1471_v24  ;;  %v765_v61 = vrot.slane %v1461_v11, %v1473_v25 }
  0x2f   : > { %v885_v62 = vrot.slane %v875_v48, %v602_v15  ;;  %v889_v63 = vrot.slane %v879_v49, %v602_v15  ;;  %v829_v0 = vrot.slane %v1463_v12, %v1471_v24  ;;  %v833_v1 = vrot.slane %v1463_v12, %v1473_v25 }
  0x30   : > { %v635_v3 = vrot.slane %v625_v50, %v1471_v24  ;;  %v639_v4 = vrot.slane %v629_v51, %v1471_v24  ;;  %v703_v5 = vrot.slane %v693_v52, %v1471_v24  ;;  %v707_v6 = vrot.slane %v697_v53, %v1471_v24 }
  0x31   : > { %v771_v13 = vrot.slane %v761_v60, %v1471_v24  ;;  %v775_v14 = vrot.slane %v765_v61, %v1471_v24  ;;  %v897_v12 = vrot.slane %v1465_v18, %v1471_v24  ;;  %v901_v15 = vrot.slane %v1465_v18, %v1473_v25 }
  0x32   : > { %v839_v19 = vrot.slane %v829_v0, %v1471_v24  ;;  %v843_v20 = vrot.slane %v833_v1, %v1471_v24 }
  0x33   : > { %v907_v1 = vrot.slane %v897_v12, %v1471_v24 }
  0x99   : > { %v560_v2 = vpop.permute.xlu0 %559  ;;  %v574_v11 = vpop.permute.xlu1 %573 }
  0x9a   : > { %v596_v7 = vmul.f32 %v591_v26, %v560_v2  ;;  %v597_v8 = vmul.f32 %v595_v27, %v560_v2  ;;  %v664_v9 = vmul.f32 %v659_v30, %v560_v2  ;;  %v665_v10 = vmul.f32 %v663_v31, %v560_v2 }
  0x9b   : > { %v732_v16 = vmul.f32 %v727_v34, %v560_v2  ;;  %v733_v17 = vmul.f32 %v731_v35, %v560_v2  ;;  %v800_v21 = vmul.f32 %v795_v36, %v560_v2  ;;  %v801_v22 = vmul.f32 %v799_v37, %v560_v2 }
  0x9c   : > { %v868_v23 = vmul.f32 %v863_v42, %v560_v2  ;;  %v869_v26 = vmul.f32 %v867_v43, %v560_v2  ;;  %v598_v28 = vadd.f32 %v596_v7, %v574_v11  ;;  %v599_v29 = vadd.f32 %v597_v8, %v574_v11 }
  0x9d   : > { %v666_v30 = vadd.f32 %v664_v9, %v574_v11  ;;  %v667_v31 = vadd.f32 %v665_v10, %v574_v11  ;;  %v734_v18 = vadd.f32 %v732_v16, %v574_v11  ;;  %v735_v25 = vadd.f32 %v733_v17, %v574_v11 }
  0x9e   : > { %v564_v27 = vpop.permute.xlu0 %563  ;;  %v568_v40 = vpop.permute.xlu1 %567  ;;  %v802_v36 = vadd.f32 %v800_v21, %v574_v11  ;;  %v803_v37 = vadd.f32 %v801_v22, %v574_v11  ;;  %v911_v2 = vrot.slane %v901_v15, %v1471_v24  ;;  %v870_v7 = vadd.f32 %v868_v23, %v574_v11 }
  0x9f   : > { %v618_v32 = vmul.f32 %v613_v46, %v564_v27  ;;  %v619_v33 = vmul.f32 %v617_v47, %v564_v27  ;;  %v686_v38 = vmul.f32 %v681_v54, %v564_v27  ;;  %v687_v39 = vmul.f32 %v685_v55, %v564_v27 }
  0xa0   : > { %v754_v34 = vmul.f32 %v749_v56, %v564_v27  ;;  %v755_v35 = vmul.f32 %v753_v57, %v564_v27  ;;  %v822_v45 = vmul.f32 %v817_v58, %v564_v27  ;;  %v823_v48 = vmul.f32 %v821_v59, %v564_v27 }
  0xa1   : > { %v620_v41 = vadd.f32 %v618_v32, %v598_v28  ;;  %v621_v44 = vadd.f32 %v619_v33, %v599_v29  ;;  %v688_v42 = vadd.f32 %v686_v38, %v666_v30  ;;  %v689_v43 = vadd.f32 %v687_v39, %v667_v31 }
  0xa2   : > { %v756_v49 = vadd.f32 %v754_v34, %v734_v18  ;;  %v757_v50 = vadd.f32 %v755_v35, %v735_v25  ;;  %v640_v51 = vmul.f32 %v635_v3, %v568_v40  ;;  %v641_v46 = vmul.f32 %v639_v4, %v568_v40 }
  0xa3   : > { %v890_v47 = vmul.f32 %v885_v62, %v564_v27  ;;  %v891_v52 = vmul.f32 %v889_v63, %v564_v27  ;;  %v708_v53 = vmul.f32 %v703_v5, %v568_v40  ;;  %v709_v54 = vmul.f32 %v707_v6, %v568_v40 }
  0xa4   : > { %v642_v55 = vadd.f32 %v640_v51, %v620_v41  ;;  %v643_v56 = vadd.f32 %v641_v46, %v621_v44  ;;  %v776_v57 = vmul.f32 %v771_v13, %v568_v40  ;;  %v777_v60 = vmul.f32 %v775_v14, %v568_v40 }
  0xa5   : > { %v710_v61 = vadd.f32 %v708_v53, %v688_v42  ;;  %v711_v0 = vadd.f32 %v709_v54, %v689_v43  ;;  %v824_v58 = vadd.f32 %v822_v45, %v802_v36  ;;  %v825_v59 = vadd.f32 %v823_v48, %v803_v37 }
  0xa6   : > { %v871_v8 = vadd.f32 %v869_v26, %v574_v11  ;;  %v844_v3 = vmul.f32 %v839_v19, %v568_v40  ;;  %v845_v4 = vmul.f32 %v843_v20, %v568_v40  ;;  %v892_v5 = vadd.f32 %v890_v47, %v870_v7 }
  0xa7   : > { %v916_v62 = vmul.f32 %v710_v61, %v642_v55  ;;  %v917_v63 = vmul.f32 %v711_v0, %v643_v56  ;;  %v778_v9 = vadd.f32 %v776_v57, %v756_v49  ;;  %v779_v10 = vadd.f32 %v777_v60, %v757_v50 }
  0xa8   : > { %v893_v6 = vadd.f32 %v891_v52, %v871_v8  ;;  %v912_v13 = vmul.f32 %v907_v1, %v568_v40  ;;  %v913_v14 = vmul.f32 %v911_v2, %v568_v40  ;;  %v846_v21 = vadd.f32 %v844_v3, %v824_v58 }
  0xa9   : > { %v926_v16 = vmul.f32 %v916_v62, %v642_v55  ;;  %v927_v17 = vmul.f32 %v917_v63, %v643_v56  ;;  %v847_v12 = vadd.f32 %v845_v4, %v825_v59  ;;  %v918_v27 = vmul.f32 %v916_v62, %v778_v9 }
  0xaa   : > { %v914_v15 = vadd.f32 %v912_v13, %v892_v5  ;;  %v915_v23 = vadd.f32 %v913_v14, %v893_v6  ;;  %v919_v28 = vmul.f32 %v917_v63, %v779_v10 }
  0xab   : > { %v928_v22 = vmul.f32 %v926_v16, %v778_v9  ;;  %v929_v24 = vmul.f32 %v927_v17, %v779_v10  ;;  %v920_v29 = vmul.f32 %v918_v27, %v846_v21 }
  0xac   : > { %v921_v30 = vmul.f32 %v919_v28, %v847_v12 }
  0xad   : > { %v930_v11 = vmul.f32 %v928_v22, %v846_v21  ;;  %v931_v19 = vmul.f32 %v929_v24, %v847_v12  ;;  %v922_v31 = vmul.f32 %v920_v29, %v914_v15 }
  0xae   : > { %v923_v32 = vmul.f32 %v921_v30, %v915_v23 }
  0xaf   : > { %v932_v20 = vmul.f32 %v930_v11, %v914_v15  ;;  %v933_v26 = vmul.f32 %v931_v19, %v915_v23  ;;  %v924_v33 = vmul.f32 %v922_v31, %v916_v62 }
  0xb0   : > { %v925_v39 = vmul.f32 %v923_v32, %v917_v63 }
  0xb1   : > { %1219 = vrcp.f32 %v932_v20 }
  0xb2   : > { %1221 = vrcp.f32 %v933_v26 }
  0xbe   : > { %v1220_v38 = vpop.eup %1219  ;;  %947 = sbr.rel (!%p1412_p3) target bundleno = 222 (0xde), region = 52 }
  0xbf   : > { %v1222_v18 = vpop.eup %1221  ;;  %v935_v25 = vmul.f32 %v1220_v38, %v924_v33 }
  0xc0   : > { %v937_v34 = vmul.f32 %v1222_v18, %v925_v39 }
  0xc1   : > { %938 = vst [vmem:[%s460_s30] sm:$0xff] %v935_v25 }
  0xc2   : > { %939 = vst [vmem:[%s460_s30 + $0x8] sm:$0xff] %v937_v34 }
  0xc3   : > { %s1609_s9 = smov (!%p950_p0, %s949_s9), 2 }
  0xc4   : > { %s1518_s20 = sshll.u32 %s1609_s9, 7 }
  0xc5   : > { %s954_s22 = ssub.s32 256, %s1518_s20 }
  0xc6   : > { %955 = vsyncadd %s1513_s12, %s954_s22  ;;  %s1140_s23 = smul.u32 3, %s1303_s28  ;;  %p1133_p1 = scmp.ne.s32.totalorder %s1518_s20, 0 }
  0xc7   : > { %s963_s27 = sshll.u32 %s460_s30, 4  ;;  %s1320_s5 = smov [#allocation2]   ;;  %s964_s27 = int_to_ptr.vmem [resolvable:$true] %s963_s27 }
  0xc8   : > { %s958_s14 = sadd.s32 %s1140_s23, %s1440_s10  ;;  %s1223_s21 = scalar_lea.vmem %s964_s27, %s1518_s20 }
  0xc9   : > { %s1134_s13 = sshll.u32 %s958_s14, 7  ;;  %p1224_p2 = scmp.ne.s32.totalorder %s964_s27, %s1223_s21 }
  0xca   : > { %s960_s18 = scalar_lea.hbm %s1579_s7, %s1134_s13  ;;  %s1227_s6 = sshll.u32 %s1320_s5, 4  ;;  %s1228_s6 = int_to_ptr.vmem [resolvable:$false] %s1227_s6 }
  0xcb   : > { %p1225_p3 = pnand %p1224_p2, %p1133_p1  ;;  %s1229_s11 = scalar_lea.vmem %s1228_s6, 512 }
  0xcc   : > { %p1230_p5 = scmp.lt.s32.totalorder %s964_s27, %s1228_s6  ;;  %p1231_p6 = scmp.lt.s32.totalorder %s1229_s11, %s1223_s21 }
  0xcd   : > { %p1226_p4 = pneg %p1225_p3 }
  0xce   : > { %p1232_p7 = por %p1231_p6, %p1230_p5 }
  0xd0   : > { %p1233_p9 = pnand %p1232_p7, %p1226_p4 }
  0xd2   : > { %1236 = shalt.err (!%p1233_p9)
}
  0xd3   : > { %s1237_s28 = scalar_lea.hbm %s960_s18, %s1518_s20  ;;  %s1241_s9 = scalar_lea.hbm %s1579_s7, 768 }
  0xd4   : > { %p1238_p10 = scmp.ne.s32.totalorder %s960_s18, %s1237_s28  ;;  %p1242_p13 = scmp.lt.s32.totalorder %s960_s18, %s1579_s7 }
  0xd5   : > { %p1243_p0 = scmp.lt.s32.totalorder %s1241_s9, %s1237_s28 }
  0xd6   : > { %p1239_p11 = pnand %p1238_p10, %p1133_p1 }
  0xd7   : > { %p1244_p2 = por %p1243_p0, %p1242_p13 }
  0xd8   : > { %p1240_p12 = pneg %p1239_p11 }
  0xda   : > { %p1245_p3 = pnand %p1244_p2, %p1240_p12 }
  0xdc   : > { %1248 = shalt.err (!%p1245_p3)
}
  0xdd   : > { %966 = dma.vmem_to_hbm [thread:$0]  (%p1133_p1), %s964_s27, %s1518_s20, %s960_s18, %s1513_s12  }
  0xde PF: > { %p1146_p4 = scmp.ge.s32.totalorder %s1315_s8, 2  ;;  %s975_s14 = sand.u32 1, %s1287_s24  }
  0xdf   : > { %s976_s13 = scalar_lea.sflag [#allocation3], %s975_s14 }
  0xe0   : > { %p1143_p5 = pnand %p1146_p4, %p1421_p8 }
  0xe2   : > { %p1144_p6 = pneg %p1143_p5 }
  0xe4   : > { %1282 = dma.done.wait (%p1144_p6), %s976_s13, 256  }
  0xe5   : > { %1284 = vsyncadd (%p1144_p6), %s976_s13, 4294967040  ;;  %s20_s8 = sadd.s32 1, %s1315_s8   ;;  %s1594_s28 = sld [smem:[#allocation5_spill]] }
  0xe6   : > { %p17_p7 = scmp.ge.s32.totalorder %s20_s8, 6   ;;  %s1595_s12 = sld [smem:[#allocation6_spill]] }
  0xe7   : > { %s1596_s30 = sld [smem:[#allocation7_spill]]  ;;  %s1597_s24 = smov %s1291_s25 }
  0xe8   : > { %s1598_s25 = smov %s1295_s26  ;;  %s1599_s26 = smov %s1430_s19 }
  0xe9   : > { %s1600_s27 = smov %s1307_s29  ;;  %19 = sbr.rel (!%p17_p7) target bundleno = 8 (0x8), region = 95 }
  0xec   : > { %s1601_s29 = smov %s1595_s12 }
  0xee   :  { %981 = vsyncpa [#allocation3], 1 }
  0xef   :  { %983 = vsyncpa [#allocation3 + $0x1], 1 }

</bundles_post_ra>
